<compile_context>
chip_gen: v7x
topology: tpu7x:2x2x1
jax: 0.10.0
libtpu: 0.0.40
codegen_flags: <defaults>
</compile_context>

<pallas_src>
import functools

import jax
import jax.numpy as jnp
from jax.experimental import pallas as pl
from jax.experimental.pallas import tpu as pltpu

# Static model dims (match the PyTorch Actor defaults).
INPUT_SIZE = 3
HIDDEN = 50
OUTPUT_SIZE = 2

# Parameter-slab geometry: one (8, 128) f32 tile (exactly one vreg, 4 KiB)
# holds w1 (3x50), b1 (50), w2^T (2x50) and b2 (2, folded into lane HIDDEN).
SLAB_ROWS = 8          # >= INPUT_SIZE + 1 + OUTPUT_SIZE, padded to sublane mult.
SLAB_LANES = 128       # >= HIDDEN + 1, padded to full lane width.


def actor_kernel(x_ref, p_ref, o_ref):
    # ---- input transform -------------------------------------------------
    x = x_ref[...]                                   # (B, IN) f32
    x = jnp.where(x == 0.0, 1.0, x)                  # x[x == 0] += 1
    x = jnp.log2(x)                                  # x = log2(x)
    mx = jnp.max(x, keepdims=True)                   # global max, shape (1, 1)
    x = x / mx                                       # x /= max(x)

    # ---- layer 1 on the VPU (contraction dim = 3, skip the MXU) ----------
    # Row INPUT_SIZE of the slab is b1 with a 1.0 at lane HIDDEN (bias lane
    # for layer 2); lanes > HIDDEN are zero, so relu keeps them zero.
    h = p_ref[INPUT_SIZE:INPUT_SIZE + 1, :]          # (1, SLAB_LANES)
    for k in range(INPUT_SIZE):                      # static unroll
        h = h + x[:, k:k + 1] * p_ref[k:k + 1, :]    # (B,1)*(1,L) -> (B,L)
    h = jnp.maximum(h, 0.0)                          # (B, SLAB_LANES)

    # ---- layer 2 + softmax, column-wise (no concat, no OUT-axis reduce) --
    base = INPUT_SIZE + 1
    cols = []
    for j in range(OUTPUT_SIZE):                     # static unroll
        wj = p_ref[base + j:base + j + 1, :]         # w2[:, j] + b2[j]@lane HIDDEN
        cols.append(jnp.sum(h * wj, axis=-1, keepdims=True))   # (B, 1)

    m = cols[0]
    for c in cols[1:]:
        m = jnp.maximum(m, c)                        # per-row max, VPU only
    exps = [jnp.exp(c - m) for c in cols]            # EUP
    denom = exps[0]
    for e in exps[1:]:
        denom = denom + e
    inv = pl.reciprocal(denom, approx=False)         # exact 1/x (tolerance-safe)
    for j in range(OUTPUT_SIZE):
        o_ref[:, j:j + 1] = exps[j] * inv            # separate column stores


def pack_actor_params(w1, b1, w2, b2):
    """One-time packing of all Actor parameters into a single (8,128) slab."""
    slab = jnp.zeros((SLAB_ROWS, SLAB_LANES), jnp.float32)
    slab = slab.at[0:INPUT_SIZE, 0:HIDDEN].set(w1)                       # W1
    slab = slab.at[INPUT_SIZE, 0:HIDDEN].set(b1)                         # b1
    slab = slab.at[INPUT_SIZE, HIDDEN].set(1.0)                          # bias lane
    slab = slab.at[INPUT_SIZE + 1:INPUT_SIZE + 1 + OUTPUT_SIZE,
                   0:HIDDEN].set(w2.T)                                   # W2^T
    slab = slab.at[INPUT_SIZE + 1:INPUT_SIZE + 1 + OUTPUT_SIZE,
                   HIDDEN].set(b2)                                       # b2
    return slab


@functools.partial(jax.jit)
def actor_forward(x, param_slab):
    # TODO(synk): if batch ever grows large, hoist the global max(x) out of
    # the kernel and tile the batch with a ("parallel",) grid axis (mind
    # v7x's smaller 64 MiB VMEM when sizing blocks).
    B = x.shape[0]
    vmem = pl.BlockSpec(memory_space=pltpu.MemorySpace.VMEM)
    return pl.pallas_call(
        actor_kernel,
        out_shape=jax.ShapeDtypeStruct((B, OUTPUT_SIZE), jnp.float32),
        in_specs=[vmem, vmem],
        out_specs=vmem,
    )(x, param_slab)


def init_linear_params(key, fan_in, fan_out):
    # Mimic torch.nn.Linear default init: U(-1/sqrt(fan_in), 1/sqrt(fan_in)).
    kw, kb = jax.random.split(key)
    bound = 1.0 / jnp.sqrt(jnp.float32(fan_in))
    w = jax.random.uniform(kw, (fan_in, fan_out), jnp.float32, -bound, bound)
    b = jax.random.uniform(kb, (fan_out,), jnp.float32, -bound, bound)
    return w, b


if __name__ == "__main__":
    BATCH = 8

    key = jax.random.PRNGKey(0)
    kx, k1, k2 = jax.random.split(key, 3)

    # Non-negative integer-valued inputs (counts-like state features).
    x = jax.random.randint(kx, (BATCH, INPUT_SIZE), 0, 16).astype(jnp.float32)
    # Deterministically exercise the x==0 branch and guarantee max(log2(x)) > 0.
    x = x.at[0, 0].set(0.0)
    x = x.at[0, 1].set(8.0)

    w1, b1 = init_linear_params(k1, INPUT_SIZE, HIDDEN)
    w2, b2 = init_linear_params(k2, HIDDEN, OUTPUT_SIZE)

    # Parameters are packed ONCE (amortized across all forward calls).
    param_slab = pack_actor_params(w1, b1, w2, b2)

    proba = actor_forward(x, param_slab)
    proba = jax.block_until_ready(proba)

    # Pure-JAX reference check of the same semantics.
    xr = jnp.where(x == 0.0, 1.0, x)
    xr = jnp.log2(xr)
    xr = xr / jnp.max(xr)
    hr = jnp.maximum(xr @ w1 + b1, 0.0)
    ref = jax.nn.softmax(hr @ w2 + b2, axis=-1)

    assert proba.shape == (BATCH, OUTPUT_SIZE)
    assert jnp.allclose(proba, ref, atol=1e-5, rtol=1e-5), "mismatch vs reference"
    assert bool(jnp.all(jnp.isfinite(proba))), "non-finite output"

    print("KERNEL_OK")
</pallas_src>

<mosaic_0001>
module attributes {stable_mosaic.version = 11 : i64} {
  func.func @actor_kernel(%arg0: memref<8x3xf32, #tpu.memory_space<vmem>>, %arg1: memref<8x128xf32, #tpu.memory_space<vmem>>, %arg2: memref<8x2xf32, #tpu.memory_space<vmem>>) attributes {dimension_semantics = [], scalar_prefetch = 0 : i64, scratch_operands = 0 : i64, tpu.core_type = #tpu.core_type<tc>} {
    %c0 = arith.constant 0 : index
    %c0_0 = arith.constant 0 : index
    %0 = vector.load %arg0[%c0, %c0_0] : memref<8x3xf32, #tpu.memory_space<vmem>>, vector<8x3xf32>
    %cst = arith.constant 0.000000e+00 : f32
    %1 = vector.broadcast %cst : f32 to vector<8x3xf32>
    %2 = arith.cmpf oeq, %0, %1 : vector<8x3xf32>
    %cst_1 = arith.constant 1.000000e+00 : f32
    %3 = vector.broadcast %cst_1 : f32 to vector<8x3xf32>
    %4 = arith.select %2, %3, %0 : vector<8x3xi1>, vector<8x3xf32>
    %5 = math.log %4 : vector<8x3xf32>
    %cst_2 = arith.constant 2.000000e+00 : f32
    %6 = math.log %cst_2 : f32
    %7 = vector.broadcast %6 : f32 to vector<8x3xf32>
    %8 = arith.divf %5, %7 : vector<8x3xf32>
    %9 = vector.shape_cast %8 : vector<8x3xf32> to vector<1x8x3xf32>
    %cst_3 = arith.constant dense<0xFF800000> : vector<1xf32>
    %10 = vector.multi_reduction <maximumf>, %9, %cst_3 [1, 2] : vector<1x8x3xf32> to vector<1xf32>
    %11 = vector.shape_cast %10 : vector<1xf32> to vector<1x1x1xf32>
    %12 = vector.extract %11[0, 0, 0] : f32 from vector<1x1x1xf32>
    %13 = vector.broadcast %12 : f32 to vector<1x1xf32>
    %14 = vector.broadcast %13 : vector<1x1xf32> to vector<8x3xf32>
    %15 = arith.divf %8, %14 : vector<8x3xf32>
    %c3 = arith.constant 3 : index
    %c0_4 = arith.constant 0 : index
    %16 = vector.load %arg1[%c3, %c0_4] : memref<8x128xf32, #tpu.memory_space<vmem>>, vector<1x128xf32>
    %17 = vector.extract_strided_slice %15 {offsets = [0, 0], sizes = [8, 1], strides = [1, 1]} : vector<8x3xf32> to vector<8x1xf32>
    %c0_5 = arith.constant 0 : index
    %c0_6 = arith.constant 0 : index
    %18 = vector.load %arg1[%c0_5, %c0_6] : memref<8x128xf32, #tpu.memory_space<vmem>>, vector<1x128xf32>
    %19 = vector.broadcast %17 : vector<8x1xf32> to vector<8x128xf32>
    %20 = vector.broadcast %18 : vector<1x128xf32> to vector<8x128xf32>
    %21 = arith.mulf %19, %20 : vector<8x128xf32>
    %22 = vector.broadcast %16 : vector<1x128xf32> to vector<8x128xf32>
    %23 = arith.addf %22, %21 : vector<8x128xf32>
    %24 = vector.extract_strided_slice %15 {offsets = [0, 1], sizes = [8, 1], strides = [1, 1]} : vector<8x3xf32> to vector<8x1xf32>
    %c1 = arith.constant 1 : index
    %c0_7 = arith.constant 0 : index
    %25 = vector.load %arg1[%c1, %c0_7] : memref<8x128xf32, #tpu.memory_space<vmem>>, vector<1x128xf32>
    %26 = vector.broadcast %24 : vector<8x1xf32> to vector<8x128xf32>
    %27 = vector.broadcast %25 : vector<1x128xf32> to vector<8x128xf32>
    %28 = arith.mulf %26, %27 : vector<8x128xf32>
    %29 = arith.addf %23, %28 : vector<8x128xf32>
    %30 = vector.extract_strided_slice %15 {offsets = [0, 2], sizes = [8, 1], strides = [1, 1]} : vector<8x3xf32> to vector<8x1xf32>
    %c2 = arith.constant 2 : index
    %c0_8 = arith.constant 0 : index
    %31 = vector.load %arg1[%c2, %c0_8] : memref<8x128xf32, #tpu.memory_space<vmem>>, vector<1x128xf32>
    %32 = vector.broadcast %30 : vector<8x1xf32> to vector<8x128xf32>
    %33 = vector.broadcast %31 : vector<1x128xf32> to vector<8x128xf32>
    %34 = arith.mulf %32, %33 : vector<8x128xf32>
    %35 = arith.addf %29, %34 : vector<8x128xf32>
    %cst_9 = arith.constant 0.000000e+00 : f32
    %36 = vector.broadcast %cst_9 : f32 to vector<8x128xf32>
    %37 = arith.maximumf %35, %36 : vector<8x128xf32>
    %c4 = arith.constant 4 : index
    %c0_10 = arith.constant 0 : index
    %38 = vector.load %arg1[%c4, %c0_10] : memref<8x128xf32, #tpu.memory_space<vmem>>, vector<1x128xf32>
    %39 = vector.broadcast %38 : vector<1x128xf32> to vector<8x128xf32>
    %40 = arith.mulf %37, %39 : vector<8x128xf32>
    %cst_11 = arith.constant dense<0.000000e+00> : vector<8xf32>
    %41 = vector.multi_reduction <add>, %40, %cst_11 [1] : vector<8x128xf32> to vector<8xf32>
    %42 = vector.shape_cast %41 : vector<8xf32> to vector<8x1xf32>
    %c5 = arith.constant 5 : index
    %c0_12 = arith.constant 0 : index
    %43 = vector.load %arg1[%c5, %c0_12] : memref<8x128xf32, #tpu.memory_space<vmem>>, vector<1x128xf32>
    %44 = vector.broadcast %43 : vector<1x128xf32> to vector<8x128xf32>
    %45 = arith.mulf %37, %44 : vector<8x128xf32>
    %cst_13 = arith.constant dense<0.000000e+00> : vector<8xf32>
    %46 = vector.multi_reduction <add>, %45, %cst_13 [1] : vector<8x128xf32> to vector<8xf32>
    %47 = vector.shape_cast %46 : vector<8xf32> to vector<8x1xf32>
    %48 = arith.maximumf %42, %47 : vector<8x1xf32>
    %49 = arith.subf %42, %48 : vector<8x1xf32>
    %50 = math.exp %49 : vector<8x1xf32>
    %51 = arith.subf %47, %48 : vector<8x1xf32>
    %52 = math.exp %51 : vector<8x1xf32>
    %53 = arith.addf %50, %52 : vector<8x1xf32>
    %54 = tpu.reciprocal %53 : vector<8x1xf32> -> vector<8x1xf32>
    %55 = arith.mulf %50, %54 : vector<8x1xf32>
    %c0_14 = arith.constant 0 : index
    %c0_15 = arith.constant 0 : index
    %56 = vector.load %arg2[%c0_14, %c0_15] : memref<8x2xf32, #tpu.memory_space<vmem>>, vector<8x1xf32>
    tpu.vector_store %arg2[%c0_14, %c0_15], %55 {strides = array<i32>} : memref<8x2xf32, #tpu.memory_space<vmem>>, vector<8x1xf32>,
    %57 = arith.mulf %52, %54 : vector<8x1xf32>
    %c0_16 = arith.constant 0 : index
    %c1_17 = arith.constant 1 : index
    %58 = vector.load %arg2[%c0_16, %c1_17] : memref<8x2xf32, #tpu.memory_space<vmem>>, vector<8x1xf32>
    tpu.vector_store %arg2[%c0_16, %c1_17], %57 {strides = array<i32>} : memref<8x2xf32, #tpu.memory_space<vmem>>, vector<8x1xf32>,
    return
  }
}

</mosaic_0001>

<bundles_post_ra>
// kernel: actor_forward.1
= control target key start
LH: loop header
LB: loop body
LE: loop exit
PB: predicated region body
PF: predicated region fallthrough
CT: control target
= control target key end

     0   :  { %vm18_vm1 = vcmask 23552   ;;  %v132_v6 = vmov 1   ;;  %v133_v7 = vmov 0   ;;  %v134_v18 = vmov 2   ;;  %s177_s0 = inlined_call_operand.vmem [shape: f32[8,3], index: 0, kind: input, shape index: {}]   ;;  %s178_s1 = inlined_call_operand.vmem [shape: f32[8,128], index: 1, kind: input, shape index: {}]   ;;  %s179_s2 = inlined_call_operand.vmem [shape: f32[8,2], index: 2, kind: output, shape index: {}]  }
   0x1   :  { %v11_v0 = vld [vmem:[%s177_s0] sm:$0xff]  ;;  %119 = vset.pattern.permute.xlu1 %v132_v6  ;;  %118 = vset.pattern.permute.xlu0 %v133_v7  ;;  %vm98_vm2 = vcmask 7168   ;;  %vm101_vm3 = vcmask 15368  }
   0x2   :  { %vm12_vm0 = vcmp.eq.f32.partialorder %v11_v0, 0.0  ;;  %v107_v19 = vld [vmem:[%s178_s1] ss:$0 sm:$0xff]  ;;  %v109_v20 = vld [vmem:[%s178_s1 + $0x1] ss:$0 sm:$0xff] }
   0x3   :  { %v13_v1 = vsel %vm12_vm0, 1.0, %v11_v0  ;;  %v108_v22 = vld [vmem:[%s178_s1 + $0x3] ss:$0 sm:$0xff]  ;;  %v110_v27 = vld [vmem:[%s178_s1 + $0x2] ss:$0 sm:$0xff] }
   0x4   :  { %122 = vlog2.f32 %v13_v1  ;;  %v111_v32 = vld [vmem:[%s178_s1 + $0x4] ss:$0 sm:$0xff]  ;;  %v112_v35 = vld [vmem:[%s178_s1 + $0x5] ss:$0 sm:$0xff] }
   0xe   :  { %v123_v2 = vpop.eup %122 }
   0xf   :  { %v15_v3 = vmul.f32 0.6931472, %v123_v2 }
  0x11   :  { %v17_v4 = vmul.f32 1.442695, %v15_v3 }
  0x13   :  { %v19_v5 = vsel %vm18_vm1, %v17_v4, -inf }
  0x14   :  { %20 = vmax.xlane.f32.xlu0 %v19_v5 }
  0xa1   :  { %v21_v8 = vpop.xlane.xlu0 %20 }
  0xa2   :  { %v22_v9 = vrot.slane %v21_v8, 4 }
  0xa4   :  { %v23_v10 = vmax.f32 %v21_v8, %v22_v9 }
  0xa6   :  { %v24_v11 = vrot.slane %v23_v10, 2 }
  0xa8   :  { %v25_v12 = vmax.f32 %v23_v10, %v24_v11 }
  0xaa   :  { %v26_v13 = vrot.slane %v25_v12, 1 }
  0xac   :  { %v27_v14 = vmax.f32 %v25_v12, %v26_v13 }
  0xae   :  { %113 = vpush %v27_v14 }
  0xdf   :  { %s114_s0 = spop %113 }
  0xe0   :  { %v29_v15 = vstv %s114_s0 }
  0xe1   :  { %124 = vrcp.f32 %v29_v15 }
  0xeb   :  { %v125_v16 = vpop.eup %124 }
  0xec   :  { %v31_v17 = vmul.f32 %v125_v16, %v17_v4 }
  0xee   :  { %51 = vperm.xlu1 %119, %v31_v17   ;;  %36 = vperm.xlu0 %118, %v31_v17  }
  0xf2   :  { %120 = vset.pattern.permute.xlu1 %v134_v18  ;;  %121 = vset.pattern.permute.xlu0 %v134_v18 }
  0xf3   :  { %62 = vperm.xlu1 %120, %v31_v17  }
 0x16d   :  { %v52_v21 = vpop.permute.xlu1 %51  ;;  %v37_v23 = vpop.permute.xlu0 %36 }
 0x16e   :  { %v43_v24 = vmul.f32 %v107_v19, %v37_v23  ;;  %v58_v25 = vmul.f32 %v109_v20, %v52_v21 }
 0x170   :  { %v48_v26 = vadd.f32 %v108_v22, %v43_v24 }
 0x172   :  { %v63_v28 = vpop.permute.xlu1 %62  ;;  %v59_v29 = vadd.f32 %v58_v25, %v48_v26 }
 0x173   :  { %v69_v30 = vmul.f32 %v110_v27, %v63_v28 }
 0x175   :  { %v70_v31 = vadd.f32 %v69_v30, %v59_v29 }
 0x177   :  { %v71_v33 = vmax.f32 %v70_v31, 0.0 }
 0x179   :  { %v77_v34 = vmul.f32 %v111_v32, %v71_v33  ;;  %v85_v36 = vmul.f32 %v112_v35, %v71_v33 }
 0x17b   :  { %78 = vadd.xlane.f32.xlu1 %v77_v34 }
 0x17f   :  { %86 = vadd.xlane.f32.xlu1 %v85_v36 }
 0x208   :  { %v79_v37 = vpop.xlane.xlu1 %78 }
 0x20c   :  { %v87_v38 = vpop.xlane.xlu1 %86 }
 0x20d   :  { %v88_v39 = vmax.f32 %v79_v37, %v87_v38 }
 0x20f   :  { %v89_v40 = vsub.f32 %v79_v37, %v88_v39  ;;  %v92_v41 = vsub.f32 %v87_v38, %v88_v39 }
 0x211   :  { %v90_v42 = vmul.f32 1.442695, %v89_v40  ;;  %v93_v43 = vmul.f32 1.442695, %v92_v41 }
 0x213   :  { %126 = vpow2.f32 %v90_v42 }
 0x214   :  { %128 = vpow2.f32 %v93_v43 }
 0x21d   :  { %v127_v44 = vpop.eup %126 }
 0x21e   :  { %v129_v45 = vpop.eup %128 }
 0x21f   :  { %v95_v46 = vadd.f32 %v129_v45, %v127_v44 }
 0x221   :  { %130 = vrcp.f32 %v95_v46 }
 0x22b   :  { %v131_v47 = vpop.eup %130 }
 0x22c   :  { %v97_v48 = vmul.f32 %v131_v47, %v127_v44  ;;  %v100_v49 = vmul.f32 %v131_v47, %v129_v45 }
 0x22e   :  { %99 = vst.msk [vmem:[%s179_s2] sm:$0xff] %vm98_vm2, %v97_v48 }
 0x22f   :  { %102 = vst.msk [vmem:[%s179_s2] sm:$0xff] %vm101_vm3, %v100_v49 }

</bundles_post_ra>
